<compile_context>
chip_gen: v5e
topology: v5e:2x2
jax: 0.10.0
libtpu: 0.0.40
codegen_flags: <defaults>
</compile_context>

<pallas_src>
import functools

import jax
import jax.numpy as jnp
from jax.experimental import pallas as pl
from jax.experimental.pallas import tpu as pltpu

_MiB = 1024 * 1024


def _round_up(v, m):
    return (v + m - 1) // m * m


def _cdiv(a, b):
    return -(-a // b)


def _vmem_budget_bytes():
    """Scoped-VMEM budget, generation aware (v7x has 64 MiB per TensorCore)."""
    cap = 128 * _MiB
    is_v7x = False
    try:
        info = pltpu.get_tpu_info()
        cap = int(info.vmem_capacity_bytes)
        if cap <= 64 * _MiB:          # per-TC capacity reported -> v7x class
            is_v7x = True
        for attr in ("chip_version", "version", "generation", "chip_name"):
            val = getattr(info, attr, None)
            if val is not None and "7" in str(val):
                is_v7x = True
    except Exception:
        pass
    if is_v7x:
        # Leave headroom (double-buffered activations + compiler scratch) out of
        # the 64 MiB per-TC VMEM.
        return min(cap, 48 * _MiB)
    return min(cap // 2, 64 * _MiB)


def _choose_batch_tile(B, per_row_bytes, param_bytes):
    budget = _vmem_budget_bytes()
    usable = max(budget - param_bytes - 4 * _MiB, 1 * _MiB)
    tb = usable // (2 * per_row_bytes)          # double-buffered activations + output
    tb = max(8, min(int(tb), 8192))
    # Megacore / pipelining: keep >= 2 grid steps (ideally ~4) when the batch is
    # big enough, but never drop below ~2048-row tiles (amortize ~0.35us/step).
    if B >= 4 * 2048:
        tb = min(tb, max(2048, _round_up(_cdiv(B, 4), 8)))
    elif B > 16:
        tb = min(tb, _round_up(_cdiv(B, 2), 8))
    tb = min(tb, _round_up(B, 8))
    tb = max((tb // 8) * 8, 8)
    return tb, budget


def _cmvae_kernel(num_interv, dim, z_dim, out_width, *refs):
    if num_interv == 0:
        (x_ref, eps_ref, wmv_ref, bmv_ref, wd_ref, bd_ref, out_ref) = refs
        c_ref = c2_ref = pp_ref = None
    elif num_interv == 1:
        (x_ref, c_ref, eps_ref, wmv_ref, bmv_ref, wd_ref, bd_ref, pp_ref,
         out_ref) = refs
        c2_ref = None
    else:
        (x_ref, c_ref, c2_ref, eps_ref, wmv_ref, bmv_ref, wd_ref, bd_ref, pp_ref,
         out_ref) = refs

    f32 = jnp.float32
    x = x_ref[...].astype(f32)            # [TB, dim]
    eps = eps_ref[...]                    # [TB, z_dim]
    tb = x.shape[0]
    odt = out_ref.dtype

    # ---- encode (packed): [TB, 2*z_dim] = x @ [W_mean.T | W_var.T] + [b_mean|b_var]
    enc = jnp.dot(x, wmv_ref[...], preferred_element_type=f32) + bmv_ref[...]
    mu = enc[:, :z_dim]
    var = jax.nn.softplus(enc[:, z_dim:])

    # ---- reparametrize: z = eps * sqrt(var) + mu
    # TODO(synk): torch samples eps as float64 (DoubleTensor); kept float32 on TPU.
    z = eps * jnp.sqrt(var) + mu

    # ---- decode with the linear DAG solve folded into the weight:
    #      dec(v) = v @ (A_inv @ W_d1.T) + b_d1
    wd = wd_ref[...]
    bd = bd_ref[...]
    x_recon = jnp.dot(z, wd, preferred_element_type=f32) + bd

    if num_interv == 0:
        y_hat = x_recon                    # zinterv == z in this mode: decode once
    else:
        # intervention shift; c_shift is folded into the order-selection matrix
        cenc = jnp.dot(c_ref[...], pp_ref[...], preferred_element_type=f32)
        shift = cenc[:, :z_dim] * cenc[:, z_dim:z_dim + 1]          # bc * csz
        if num_interv >= 2:
            cenc2 = jnp.dot(c2_ref[...], pp_ref[...], preferred_element_type=f32)
            shift = shift + cenc2[:, :z_dim] * cenc2[:, z_dim:z_dim + 1]
        y_hat = jnp.dot(z + shift, wd, preferred_element_type=f32) + bd

    # ---- write straight into the lane slices of the fused output slab
    out_ref[:, 0:dim] = y_hat.astype(odt)
    out_ref[:, dim:2 * dim] = x_recon.astype(odt)
    out_ref[:, 2 * dim:2 * dim + z_dim] = mu.astype(odt)
    out_ref[:, 2 * dim + z_dim:2 * dim + 2 * z_dim] = var.astype(odt)
    pad = out_width - (2 * dim + 2 * z_dim)
    if pad:
        out_ref[:, 2 * dim + 2 * z_dim:] = jnp.zeros((tb, pad), dtype=odt)


def cmvae_forward(x, c, c2, eps,
                  W_mean, b_mean, W_var, b_var, W_d1, b_d1,
                  G, c_shift, order, num_interv=1,
                  out_dtype=jnp.bfloat16, stream_x_bf16=False):
    """Returns (y_hat, x_recon, mu, var, G) like CMVAE_simu.forward (nonlinear=False)."""
    assert num_interv in (0, 1, 2)
    B, dim = x.shape
    z_dim = W_mean.shape[0]
    c_dim = c.shape[1]
    f32 = jnp.float32

    # ---- plain-JAX glue: packed / folded parameter preprocessing ----
    # TODO(synk): if G / order / linear weights are fixed across forward calls,
    # hoist this block (incl. the tiny z_dim x z_dim inverse) out of the per-call path.
    W_mv = jnp.concatenate([W_mean.T, W_var.T], axis=1).astype(f32)          # [dim, 2*z_dim]
    b_mv = jnp.concatenate([b_mean, b_var]).reshape(1, 2 * z_dim).astype(f32)
    # Fold the linear DAG solve into the decode weight:
    #   u = zinterv @ A_inv ; y = u @ W_d1.T  =>  y = zinterv @ (A_inv @ W_d1.T)
    # TODO(synk): torch.inverse has no Pallas primitive; tiny inverse in JAX glue.
    A_inv = jnp.linalg.inv(jnp.eye(z_dim, dtype=f32) - jnp.triu(G.astype(f32), 1))
    Wd_eff = (A_inv @ W_d1.T.astype(f32)).astype(f32)                        # [z_dim, dim]
    bd = b_d1.reshape(1, dim).astype(f32)
    P = jnp.zeros((c_dim, z_dim), f32).at[
        jnp.asarray(order), jnp.arange(z_dim)].set(1.0)
    Pp = jnp.concatenate([P, c_shift.reshape(c_dim, 1).astype(f32)], axis=1)  # [c_dim, z_dim+1]

    out_cols = 2 * dim + 2 * z_dim
    out_width = _round_up(out_cols, 128)
    # TODO(synk): A/B-test an unpadded out_width == out_cols (masked vst, fewer HBM bytes).

    x_in = x.astype(jnp.bfloat16) if stream_x_bf16 else x.astype(f32)
    eps_in = eps.astype(f32)

    param_arrays = [W_mv, b_mv, Wd_eff, bd]
    in_arrays = [x_in]
    act_feats = [(dim, x_in.dtype)]
    if num_interv >= 1:
        in_arrays.append(c.astype(f32))
        act_feats.append((c_dim, f32))
    if num_interv >= 2:
        in_arrays.append(c2.astype(f32))
        act_feats.append((c_dim, f32))
    in_arrays.append(eps_in)
    act_feats.append((z_dim, f32))
    if num_interv >= 1:
        param_arrays = param_arrays + [Pp]
    in_arrays = in_arrays + param_arrays

    param_bytes = sum(int(a.size) * jnp.dtype(a.dtype).itemsize for a in param_arrays)
    out_itemsize = jnp.dtype(out_dtype).itemsize
    per_row = (sum(f * jnp.dtype(dt).itemsize for f, dt in act_feats)
               + out_width * out_itemsize)
    TB, vmem_limit = _choose_batch_tile(B, per_row, param_bytes)
    grid = (pl.cdiv(B, TB),)

    def act_spec(feat):
        return pl.BlockSpec((TB, feat), lambda i: (i, 0))

    def param_spec(arr):
        return pl.BlockSpec(arr.shape, lambda i: (0, 0))

    in_specs = ([act_spec(f) for f, _ in act_feats]
                + [param_spec(a) for a in param_arrays])

    # Advisory cost estimate: this kernel is HBM-bandwidth bound.
    decode_passes = 1 if num_interv == 0 else 2
    flops = 2 * B * dim * 2 * z_dim + decode_passes * 2 * B * z_dim * dim
    if num_interv >= 1:
        flops += 2 * B * c_dim * (z_dim + 1) * (2 if num_interv == 2 else 1)
    flops += 8 * B * z_dim
    cost = pl.CostEstimate(flops=int(flops),
                           transcendentals=int(2 * B * z_dim),
                           bytes_accessed=int(B * per_row + param_bytes))

    out = pl.pallas_call(
        functools.partial(_cmvae_kernel, num_interv, dim, z_dim, out_width),
        out_shape=jax.ShapeDtypeStruct((B, out_width), out_dtype),
        grid=grid,
        in_specs=in_specs,
        out_specs=pl.BlockSpec((TB, out_width), lambda i: (i, 0)),
        compiler_params=pltpu.CompilerParams(
            dimension_semantics=("parallel",),
            vmem_limit_bytes=int(vmem_limit)),
        cost_estimate=cost,
    )(*in_arrays)

    y_hat = out[:, :dim]
    x_recon = out[:, dim:2 * dim]
    mu = out[:, 2 * dim:2 * dim + z_dim]
    var = out[:, 2 * dim + z_dim:out_cols]
    return y_hat, x_recon, mu, var, G


def _reference_forward(x, c, c2, eps,
                       W_mean, b_mean, W_var, b_var, W_d1, b_d1,
                       G, c_shift, order, num_interv=1):
    """Pure-JAX reference mirroring the PyTorch forward (nonlinear=False)."""
    z_dim = W_mean.shape[0]
    mu = x @ W_mean.T + b_mean
    var = jax.nn.softplus(x @ W_var.T + b_var)
    z = eps * jnp.sqrt(var) + mu
    bc = c[:, jnp.asarray(order)]
    csz = c @ c_shift
    bc2 = c2[:, jnp.asarray(order)]
    csz2 = c2 @ c_shift
    if num_interv == 0:
        zinterv = z
    elif num_interv == 1:
        zinterv = z + bc * csz[:, None]
    else:
        zinterv = z + (bc * csz[:, None] + bc2 * csz2[:, None])
    A_inv = jnp.linalg.inv(jnp.eye(z_dim, dtype=x.dtype) - jnp.triu(G, 1))
    u = zinterv @ A_inv
    y_hat = u @ W_d1.T + b_d1
    x_recon = (z @ A_inv) @ W_d1.T + b_d1
    return y_hat, x_recon, mu, var


if __name__ == "__main__":
    B, DIM, Z_DIM, C_DIM = 8, 32, 8, 8
    NUM_INTERV = 1

    key = jax.random.PRNGKey(0)
    k = jax.random.split(key, 8)

    # nn.Linear weights ~ N(0, 0.02), biases = 0; G ~ N(0, 0.1); c_shift = ones
    W_mean = 0.02 * jax.random.normal(k[0], (Z_DIM, DIM), jnp.float32)   # torch [out, in]
    b_mean = jnp.zeros((Z_DIM,), jnp.float32)
    W_var = 0.02 * jax.random.normal(k[1], (Z_DIM, DIM), jnp.float32)
    b_var = jnp.zeros((Z_DIM,), jnp.float32)
    W_d1 = 0.02 * jax.random.normal(k[2], (DIM, Z_DIM), jnp.float32)
    b_d1 = jnp.zeros((DIM,), jnp.float32)
    G = 0.1 * jax.random.normal(k[3], (Z_DIM, Z_DIM), jnp.float32)
    c_shift = jnp.ones((C_DIM,), jnp.float32)
    order = tuple(reversed(range(Z_DIM)))   # column-selection indices, len == z_dim

    x = jax.random.normal(k[4], (B, DIM), jnp.float32)
    c = jax.random.normal(k[5], (B, C_DIM), jnp.float32)
    c2 = jax.random.normal(k[6], (B, C_DIM), jnp.float32)
    eps = jax.random.normal(k[7], (B, Z_DIM), jnp.float32)   # reparametrization noise

    # Pure-JAX reference.
    ry, rx, rmu, rvar = _reference_forward(
        x, c, c2, eps, W_mean, b_mean, W_var, b_var, W_d1, b_d1,
        G, c_shift, order, num_interv=NUM_INTERV)

    # Strict f32-output run (verifies the A_inv fold keeps 1e-5 numerics).
    y32, x32, mu32, var32, G32 = cmvae_forward(
        x, c, c2, eps, W_mean, b_mean, W_var, b_var, W_d1, b_d1,
        G, c_shift, order, num_interv=NUM_INTERV, out_dtype=jnp.float32)
    jax.block_until_ready((y32, x32, mu32, var32))
    assert jnp.allclose(y32, ry, atol=1e-5), "y_hat (f32) mismatch"
    assert jnp.allclose(x32, rx, atol=1e-5), "x_recon (f32) mismatch"
    assert jnp.allclose(mu32, rmu, atol=1e-5), "mu (f32) mismatch"
    assert jnp.allclose(var32, rvar, atol=1e-5), "var (f32) mismatch"
    assert jnp.allclose(G32, G), "G mismatch"

    # Performance-default bf16-output run (halves writeback HBM traffic).
    yb, xb, mub, varb, _ = cmvae_forward(
        x, c, c2, eps, W_mean, b_mean, W_var, b_var, W_d1, b_d1,
        G, c_shift, order, num_interv=NUM_INTERV)
    jax.block_until_ready((yb, xb, mub, varb))
    assert jnp.allclose(yb.astype(jnp.float32), ry, atol=1e-2), "y_hat (bf16) mismatch"
    assert jnp.allclose(xb.astype(jnp.float32), rx, atol=1e-2), "x_recon (bf16) mismatch"
    assert jnp.allclose(mub.astype(jnp.float32), rmu, atol=1e-2), "mu (bf16) mismatch"
    assert jnp.allclose(varb.astype(jnp.float32), rvar, atol=1e-2), "var (bf16) mismatch"

    print("KERNEL_OK")
</pallas_src>

<mosaic_0001>
module attributes {stable_mosaic.version = 11 : i64} {
  func.func @_cmvae_kernel(%arg0: i32, %arg1: memref<8x32xf32, #tpu.memory_space<vmem>>, %arg2: memref<8x8xf32, #tpu.memory_space<vmem>>, %arg3: memref<8x8xf32, #tpu.memory_space<vmem>>, %arg4: memref<32x16xf32, #tpu.memory_space<vmem>>, %arg5: memref<1x16xf32, #tpu.memory_space<vmem>>, %arg6: memref<8x32xf32, #tpu.memory_space<vmem>>, %arg7: memref<1x32xf32, #tpu.memory_space<vmem>>, %arg8: memref<8x9xf32, #tpu.memory_space<vmem>>, %arg9: memref<8x128xf32, #tpu.memory_space<vmem>>) attributes {dimension_semantics = [#tpu.dimension_semantics<parallel>], iteration_bounds = array<i64: 1>, scalar_prefetch = 0 : i64, scratch_operands = 0 : i64, tpu.core_type = #tpu.core_type<tc>, window_params = [{transform_indices = @transform_0, window_bounds = array<i64: 8, 32>}, {transform_indices = @transform_1, window_bounds = array<i64: 8, 8>}, {transform_indices = @transform_2, window_bounds = array<i64: 8, 8>}, {pipeline_mode = #tpu.pipeline_mode<synchronous>, transform_indices = @transform_3, window_bounds = array<i64: 32, 16>}, {pipeline_mode = #tpu.pipeline_mode<synchronous>, transform_indices = @transform_4, window_bounds = array<i64: 1, 16>}, {pipeline_mode = #tpu.pipeline_mode<synchronous>, transform_indices = @transform_5, window_bounds = array<i64: 8, 32>}, {pipeline_mode = #tpu.pipeline_mode<synchronous>, transform_indices = @transform_6, window_bounds = array<i64: 1, 32>}, {pipeline_mode = #tpu.pipeline_mode<synchronous>, transform_indices = @transform_7, window_bounds = array<i64: 8, 9>}, {transform_indices = @transform_8, window_bounds = array<i64: 8, 128>}]} {
    %c0 = arith.constant 0 : index
    %c0_0 = arith.constant 0 : index
    %0 = vector.load %arg1[%c0, %c0_0] : memref<8x32xf32, #tpu.memory_space<vmem>>, vector<8x32xf32>
    %c0_1 = arith.constant 0 : index
    %c0_2 = arith.constant 0 : index
    %1 = vector.load %arg3[%c0_1, %c0_2] : memref<8x8xf32, #tpu.memory_space<vmem>>, vector<8x8xf32>
    %c0_3 = arith.constant 0 : index
    %c0_4 = arith.constant 0 : index
    %2 = vector.load %arg4[%c0_3, %c0_4] : memref<32x16xf32, #tpu.memory_space<vmem>>, vector<32x16xf32>
    %cst = arith.constant dense<0.000000e+00> : vector<8x16xf32>
    %3 = tpu.matmul %0, %2, %cst {dimension_numbers = #tpu.dot_dimension_numbers<[1], [0], [0], [1], [0, 0, 1, 1], [], []>} : vector<8x32xf32>, vector<32x16xf32>, vector<8x16xf32> -> vector<8x16xf32>
    %c0_5 = arith.constant 0 : index
    %c0_6 = arith.constant 0 : index
    %4 = vector.load %arg5[%c0_5, %c0_6] : memref<1x16xf32, #tpu.memory_space<vmem>>, vector<1x16xf32>
    %5 = vector.broadcast %4 : vector<1x16xf32> to vector<8x16xf32>
    %6 = arith.addf %3, %5 : vector<8x16xf32>
    %7 = vector.extract_strided_slice %6 {offsets = [0, 0], sizes = [8, 8], strides = [1, 1]} : vector<8x16xf32> to vector<8x8xf32>
    %8 = vector.extract_strided_slice %6 {offsets = [0, 8], sizes = [8, 8], strides = [1, 1]} : vector<8x16xf32> to vector<8x8xf32>
    %cst_7 = arith.constant 0.000000e+00 : f32
    %9 = vector.broadcast %cst_7 : f32 to vector<8x8xf32>
    %10 = arith.maximumf %8, %9 : vector<8x8xf32>
    %11 = vector.broadcast %cst_7 : f32 to vector<8x8xf32>
    %12 = arith.subf %8, %11 : vector<8x8xf32>
    %13 = arith.cmpf one, %12, %12 : vector<8x8xf32>
    %14 = vector.broadcast %cst_7 : f32 to vector<8x8xf32>
    %15 = arith.addf %8, %14 : vector<8x8xf32>
    %16 = math.absf %12 : vector<8x8xf32>
    %cst_8 = arith.constant 0.000000e+00 : f32
    %17 = vector.broadcast %cst_8 : f32 to vector<8x8xf32>
    %18 = arith.subf %17, %16 : vector<8x8xf32>
    %19 = math.exp %18 : vector<8x8xf32>
    %20 = math.log1p %19 : vector<8x8xf32>
    %21 = arith.addf %10, %20 : vector<8x8xf32>
    %22 = arith.select %13, %15, %21 : vector<8x8xi1>, vector<8x8xf32>
    %23 = math.sqrt %22 : vector<8x8xf32>
    %24 = arith.mulf %1, %23 : vector<8x8xf32>
    %25 = arith.addf %24, %7 : vector<8x8xf32>
    %c0_9 = arith.constant 0 : index
    %c0_10 = arith.constant 0 : index
    %26 = vector.load %arg6[%c0_9, %c0_10] : memref<8x32xf32, #tpu.memory_space<vmem>>, vector<8x32xf32>
    %c0_11 = arith.constant 0 : index
    %c0_12 = arith.constant 0 : index
    %27 = vector.load %arg7[%c0_11, %c0_12] : memref<1x32xf32, #tpu.memory_space<vmem>>, vector<1x32xf32>
    %cst_13 = arith.constant dense<0.000000e+00> : vector<8x32xf32>
    %28 = tpu.matmul %25, %26, %cst_13 {dimension_numbers = #tpu.dot_dimension_numbers<[1], [0], [0], [1], [0, 0, 1, 1], [], []>} : vector<8x8xf32>, vector<8x32xf32>, vector<8x32xf32> -> vector<8x32xf32>
    %29 = vector.broadcast %27 : vector<1x32xf32> to vector<8x32xf32>
    %30 = arith.addf %28, %29 : vector<8x32xf32>
    %c0_14 = arith.constant 0 : index
    %c0_15 = arith.constant 0 : index
    %31 = vector.load %arg2[%c0_14, %c0_15] : memref<8x8xf32, #tpu.memory_space<vmem>>, vector<8x8xf32>
    %c0_16 = arith.constant 0 : index
    %c0_17 = arith.constant 0 : index
    %32 = vector.load %arg8[%c0_16, %c0_17] : memref<8x9xf32, #tpu.memory_space<vmem>>, vector<8x9xf32>
    %cst_18 = arith.constant dense<0.000000e+00> : vector<8x9xf32>
    %33 = tpu.matmul %31, %32, %cst_18 {dimension_numbers = #tpu.dot_dimension_numbers<[1], [0], [0], [1], [0, 0, 1, 1], [], []>} : vector<8x8xf32>, vector<8x9xf32>, vector<8x9xf32> -> vector<8x9xf32>
    %34 = vector.extract_strided_slice %33 {offsets = [0, 0], sizes = [8, 8], strides = [1, 1]} : vector<8x9xf32> to vector<8x8xf32>
    %35 = vector.extract_strided_slice %33 {offsets = [0, 8], sizes = [8, 1], strides = [1, 1]} : vector<8x9xf32> to vector<8x1xf32>
    %36 = vector.broadcast %35 : vector<8x1xf32> to vector<8x8xf32>
    %37 = arith.mulf %34, %36 : vector<8x8xf32>
    %38 = arith.addf %25, %37 : vector<8x8xf32>
    %cst_19 = arith.constant dense<0.000000e+00> : vector<8x32xf32>
    %39 = tpu.matmul %38, %26, %cst_19 {dimension_numbers = #tpu.dot_dimension_numbers<[1], [0], [0], [1], [0, 0, 1, 1], [], []>} : vector<8x8xf32>, vector<8x32xf32>, vector<8x32xf32> -> vector<8x32xf32>
    %40 = vector.broadcast %27 : vector<1x32xf32> to vector<8x32xf32>
    %41 = arith.addf %39, %40 : vector<8x32xf32>
    %c0_20 = arith.constant 0 : index
    %c0_21 = arith.constant 0 : index
    %42 = vector.load %arg9[%c0_20, %c0_21] : memref<8x128xf32, #tpu.memory_space<vmem>>, vector<8x32xf32>
    tpu.vector_store %arg9[%c0_20, %c0_21], %41 {strides = array<i32>} : memref<8x128xf32, #tpu.memory_space<vmem>>, vector<8x32xf32>,
    %c0_22 = arith.constant 0 : index
    %c32 = arith.constant 32 : index
    %43 = vector.load %arg9[%c0_22, %c32] : memref<8x128xf32, #tpu.memory_space<vmem>>, vector<8x32xf32>
    tpu.vector_store %arg9[%c0_22, %c32], %30 {strides = array<i32>} : memref<8x128xf32, #tpu.memory_space<vmem>>, vector<8x32xf32>,
    %c0_23 = arith.constant 0 : index
    %c64 = arith.constant 64 : index
    %44 = vector.load %arg9[%c0_23, %c64] : memref<8x128xf32, #tpu.memory_space<vmem>>, vector<8x8xf32>
    tpu.vector_store %arg9[%c0_23, %c64], %7 {strides = array<i32>} : memref<8x128xf32, #tpu.memory_space<vmem>>, vector<8x8xf32>,
    %c0_24 = arith.constant 0 : index
    %c72 = arith.constant 72 : index
    %45 = vector.load %arg9[%c0_24, %c72] : memref<8x128xf32, #tpu.memory_space<vmem>>, vector<8x8xf32>
    tpu.vector_store %arg9[%c0_24, %c72], %22 {strides = array<i32>} : memref<8x128xf32, #tpu.memory_space<vmem>>, vector<8x8xf32>,
    %cst_25 = arith.constant 0.000000e+00 : f32
    %46 = vector.broadcast %cst_25 : f32 to vector<8x48xf32>
    %c0_26 = arith.constant 0 : index
    %c80 = arith.constant 80 : index
    %47 = vector.load %arg9[%c0_26, %c80] : memref<8x128xf32, #tpu.memory_space<vmem>>, vector<8x48xf32>
    tpu.vector_store %arg9[%c0_26, %c80], %46 {strides = array<i32>} : memref<8x128xf32, #tpu.memory_space<vmem>>, vector<8x48xf32>,
    return
  }
  func.func @transform_0(%arg0: i32) -> (i32, i32) {
    %c0_i32 = arith.constant 0 : i32
    %c0_i32_0 = arith.constant 0 : i32
    return %arg0, %c0_i32 : i32, i32
  }
  func.func @transform_1(%arg0: i32) -> (i32, i32) {
    %c0_i32 = arith.constant 0 : i32
    %c0_i32_0 = arith.constant 0 : i32
    return %arg0, %c0_i32 : i32, i32
  }
  func.func @transform_2(%arg0: i32) -> (i32, i32) {
    %c0_i32 = arith.constant 0 : i32
    %c0_i32_0 = arith.constant 0 : i32
    return %arg0, %c0_i32 : i32, i32
  }
  func.func @transform_3(%arg0: i32) -> (i32, i32) {
    %c0_i32 = arith.constant 0 : i32
    %c0_i32_0 = arith.constant 0 : i32
    %c0_i32_1 = arith.constant 0 : i32
    return %c0_i32, %c0_i32_0 : i32, i32
  }
  func.func @transform_4(%arg0: i32) -> (i32, i32) {
    %c0_i32 = arith.constant 0 : i32
    %c0_i32_0 = arith.constant 0 : i32
    %c0_i32_1 = arith.constant 0 : i32
    return %c0_i32, %c0_i32_0 : i32, i32
  }
  func.func @transform_5(%arg0: i32) -> (i32, i32) {
    %c0_i32 = arith.constant 0 : i32
    %c0_i32_0 = arith.constant 0 : i32
    %c0_i32_1 = arith.constant 0 : i32
    return %c0_i32, %c0_i32_0 : i32, i32
  }
  func.func @transform_6(%arg0: i32) -> (i32, i32) {
    %c0_i32 = arith.constant 0 : i32
    %c0_i32_0 = arith.constant 0 : i32
    %c0_i32_1 = arith.constant 0 : i32
    return %c0_i32, %c0_i32_0 : i32, i32
  }
  func.func @transform_7(%arg0: i32) -> (i32, i32) {
    %c0_i32 = arith.constant 0 : i32
    %c0_i32_0 = arith.constant 0 : i32
    %c0_i32_1 = arith.constant 0 : i32
    return %c0_i32, %c0_i32_0 : i32, i32
  }
  func.func @transform_8(%arg0: i32) -> (i32, i32) {
    %c0_i32 = arith.constant 0 : i32
    %c0_i32_0 = arith.constant 0 : i32
    return %arg0, %c0_i32 : i32, i32
  }
}

</mosaic_0001>

<bundles_post_ra>
// kernel: tpu_custom_call.1
= control target key start
LH: loop header
LB: loop body
LE: loop exit
PB: predicated region body
PF: predicated region fallthrough
CT: control target
= control target key end

     0   :  { %vm105_vm0 = vcmask 64512   ;;  %s360_s0 = inlined_call_operand.vmem [shape: f32[8,32], index: 0, kind: input, shape index: {}]   ;;  %s361_s1 = inlined_call_operand.vmem [shape: f32[8,8], index: 1, kind: input, shape index: {}]   ;;  %s362_s2 = inlined_call_operand.vmem [shape: f32[8,8], index: 2, kind: input, shape index: {}]   ;;  %s363_s3 = inlined_call_operand.vmem [shape: f32[32,16], index: 3, kind: input, shape index: {}]   ;;  %s364_s4 = inlined_call_operand.vmem [shape: f32[1,16], index: 4, kind: input, shape index: {}]   ;;  %s365_s5 = inlined_call_operand.vmem [shape: f32[8,32], index: 5, kind: input, shape index: {}]   ;;  %s366_s6 = inlined_call_operand.vmem [shape: f32[1,32], index: 6, kind: input, shape index: {}]   ;;  %s367_s7 = inlined_call_operand.vmem [shape: f32[8,9], index: 7, kind: input, shape index: {}]   ;;  %s368_s8 = inlined_call_operand.hbm [shape: f32[8,128], index: 8, kind: output, shape index: {}]  }
   0x1   :  { %v35_v0 = vld [vmem:[%s363_s3 + $0x18] sm:$0xff]  ;;  %v34_v1 = vld [vmem:[%s363_s3 + $0x10] sm:$0xff]  ;;  %v130_v2 = vld [vmem:[%s367_s7] sm:$0xff] }
   0x2   :  { %56 = vmatpush.msra.mxu0 %v35_v0  ;;  %v33_v3 = vld [vmem:[%s363_s3 + $0x8] sm:$0xff]  ;;  %149 = vmatpush.msra.mxu2 %v130_v2  ;;  %v129_v4 = vld [vmem:[%s361_s1] sm:$0xff] }
   0x3   :  { %223 = vmatmul.msk.f32.vlgmr.msra.gmra.mxu2 %vm105_vm0, %v129_v4 }
   0x4   :  { %57 = vmatpush.msra.mxu0 %v34_v1 }
   0x5   :  { %13 = vsyncpa [#allocation3], 0  ;;  %v32_v5 = vld [vmem:[%s363_s3] sm:$0xff]  ;;  %vm40_vm1 = vcmask 261120   ;;  %v266_v17 = vmov 8   ;;  %s268_s1 = smov 120  }
   0x6   :  { %58 = vmatpush.msra.mxu0 %v33_v3  ;;  %v30_v6 = vld [vmem:[%s360_s0] sm:$0xff]  ;;  %231 = vset.pattern.permute.xlu0 %v266_v17  ;;  %s267_s0 = smov 64   ;;  %vm189_vm6 = vcmask 523520   ;;  %vm195_vm7 = vcmask 589312   ;;  %vm201_vm8 = vcmask 654912   ;;  %vm203_vm9 = vcmask 1048192  }
   0x7   :  { %v232_v7 = vld [vmem:[%s364_s4] ss:$0 sm:$0xff]  ;;  %v271_v53 = vmov 0.0  }
   0x8   :  { %59 = vmatpush.msra.mxu0 %v32_v5  ;;  %v100_v37 = vld [vmem:[%s365_s5] sm:$0xff]  ;;  %s269_s5 = smov 32  }
   0x9   :  { %221 = vmatmul.msk.f32.vlgmr.msra.gmra.mxu0 %vm40_vm1, %v30_v6  ;;  %124 = vmatpush.msra.mxu1 %v100_v37  ;;  %v31_v38 = vld [vmem:[%s362_s2] sm:$0xff]  ;;  %s270_s2 = smov [#allocation2]  }
   0xa   :  { %179 = vmatpush.msra.mxu3 %v100_v37  ;;  %v233_v45 = vld [vmem:[%s366_s6] ss:$0 sm:$0xff]  ;;  %s210_s24 = sshll.u32 %s270_s2, 4  ;;  %s212_s6 = sshll.u32 %s368_s8, 4  ;;  %s211_s24 = int_to_ptr.vmem [resolvable:$true] %s210_s24  ;;  %s213_s6 = int_to_ptr.hbm [resolvable:$true] %s212_s6 }
  0x86   :  { %v61_v8 = vpop.f32.mrf.mxu0  ;;  %v151_v36 = vpop.f32.mrf.mxu2 }
  0x87   :  { %v62_v9 = vadd.f32 %v232_v7, %v61_v8 }
  0x89   :  { %v67_v10 = vand.u32 2147483647, %v62_v9  ;;  %v64_v22 = vmax.f32 %v62_v9, 0.0  ;;  %vm65_vm3 = vcmp.ne.f32.partialorder %v62_v9, %v62_v9 }
  0x8b   :  { %v68_v11 = vsub.f32 0.0, %v67_v10 }
  0x8d   :  { %v69_v12 = vmul.f32 1.442695, %v68_v11 }
  0x8f   :  { %234 = vpow2.f32 %v69_v12 }
  0x95   :  { %v235_v13 = vpop.eup %234 }
  0x96   :  { %v71_v14 = vadd.f32 1.0, %v235_v13  ;;  %v74_v15 = vmul.f32 -0.5, %v235_v13  ;;  %v77_v18 = vand.u32 2147483647, %v235_v13 }
  0x98   :  { %236 = vlog2.f32 %v71_v14  ;;  %v75_v16 = vadd.f32 1.0, %v74_v15  ;;  %vm78_vm2 = vcmp.lt.f32.partialorder %v77_v18, 0.0004427343 }
  0x9a   :  { %v76_v21 = vmul.f32 %v235_v13, %v75_v16 }
  0x9e   :  { %v237_v19 = vpop.eup %236 }
  0x9f   :  { %v73_v20 = vmul.f32 0.6931472, %v237_v19 }
  0xa1   :  { %v79_v23 = vsel %vm78_vm2, %v76_v21, %v73_v20 }
  0xa2   :  { %v80_v24 = vadd.f32 %v79_v23, %v64_v22 }
  0xa4   :  { %v81_v25 = vsel %vm65_vm3, %v62_v9, %v80_v24 }
  0xa5   :  { %198 = vrot.lane.b32.xlu2 %v81_v25, %s267_s0  ;;  %238 = vrsqrt.f32 %v81_v25  ;;  %vm89_vm4 = vcmp.eq.f32.partialorder %v81_v25, inf  ;;  %v92_v33 = vand.u32 2147483648, %v81_v25  ;;  %vm91_vm5 = vcmp.eq.f32.partialorder %v81_v25, 0.0 }
  0xab   :  { %v239_v26 = vpop.eup %238 }
  0xac   :  { %v83_v27 = vmul.f32 %v239_v26, %v81_v25 }
  0xae   :  { %v84_v28 = vmul.f32 %v239_v26, %v83_v27 }
  0xb0   :  { %v85_v29 = vmul.f32 0.5, %v84_v28 }
  0xb2   :  { %v86_v30 = vsub.f32 1.5, %v85_v29 }
  0xb4   :  { %v87_v31 = vmul.f32 %v239_v26, %v86_v30 }
  0xb6   :  { %v88_v32 = vmul.f32 %v87_v31, %v81_v25 }
  0xb8   :  { %v90_v34 = vsel %vm89_vm4, %v81_v25, %v88_v32 }
  0xb9   :  { %v93_v35 = vsel %vm91_vm5, %v92_v33, %v90_v34 }
  0xba   :  { %95 = vrot.lane.b32.xlu0 %v93_v35, %s268_s1 }
  0xc2   :  { %156 = vperm.xlu0 %231, %v151_v36  }
  0xff   :  { %v199_v52 = vpop.permute.xlu2 %198 }
 0x12c   :  { %v96_v39 = vpop.permute.xlu0 %95 }
 0x12d   :  { %v98_v40 = vmul.f32 %v96_v39, %v31_v38 }
 0x12f   :  { %v99_v41 = vadd.f32 %v98_v40, %v62_v9 }
 0x131   :  { %222 = vmatmul.msk.f32.vlgmr.msra.gmra.mxu1 %vm105_vm0, %v99_v41 }
 0x134   :  { %v157_v42 = vpop.permute.xlu0 %156 }
 0x135   :  { %v159_v43 = vmul.f32 %v157_v42, %v151_v36 }
 0x137   :  { %v160_v44 = vadd.f32 %v159_v43, %v99_v41 }
 0x139   :  { %224 = vmatmul.msk.f32.vlgmr.msra.gmra.mxu3 %vm105_vm0, %v160_v44 }
 0x1ae   :  { %v126_v46 = vpop.f32.mrf.mxu1 }
 0x1af   :  { %v127_v47 = vadd.f32 %v233_v45, %v126_v46 }
 0x1b1   :  { %186 = vrot.lane.b32.xlu1 %v127_v47, %s269_s5 }
 0x1b9   :  { %192 = vrot.lane.b32.xlu1 %v62_v9, %s267_s0 }
 0x1bc   :  { %v181_v48 = vpop.f32.mrf.mxu3 }
 0x1bd   :  { %v182_v49 = vadd.f32 %v233_v45, %v181_v48 }
 0x1bf   :  { %184 = vst.msk [vmem:[#allocation2] sm:$0xff] %vm40_vm1, %v182_v49 }
 0x223   :  { %v187_v50 = vpop.permute.xlu1 %186 }
 0x224   :  { %190 = vst.msk [vmem:[#allocation2] sm:$0xff] %vm189_vm6, %v187_v50 }
 0x22b   :  { %v193_v51 = vpop.permute.xlu1 %192 }
 0x22c   :  { %196 = vst.msk [vmem:[#allocation2] sm:$0xff] %vm195_vm7, %v193_v51 }
 0x22d   :  { %202 = vst.msk [vmem:[#allocation2] sm:$0xff] %vm201_vm8, %v199_v52 }
 0x22e   :  { %204 = vst.msk [vmem:[#allocation2] sm:$0xff] %vm203_vm9, %v271_v53 }
 0x22f   :  { %215 = dma.vmem_to_hbm [thread:$0]  %s211_s24, 128, %s213_s6, [#allocation3]  }
 0x230   :  { %264 = dma.done.wait [#allocation3], 128  }
 0x231   :  { %265 = vsyncadd [#allocation3], 4294967168 }
 0x232   :  { %220 = vsyncpa [#allocation3], 1 }

</bundles_post_ra>
